<compile_context>
chip_gen: v6e
topology: v6e:2x2x1
jax: 0.10.0
libtpu: 0.0.40
codegen_flags: <defaults>
</compile_context>

<pallas_src>
import functools

import jax
import jax.numpy as jnp
from jax import lax
from jax.experimental import pallas as pl
from jax.experimental.pallas import tpu as pltpu

LANES = 128
SUBLANES = 8
_GROUP = SUBLANES * LANES          # 1024 elements = one (8, 128) f32 vreg tile
_DEFAULT_BLOCK_ROWS = 8192         # 1024 groups -> 4 MiB f32 per input block
_DEFAULT_CHUNK_ROWS = 512          # streaming sub-chunk inside one block


def _bce_chunk(x, t, row0, valid_rows, mask):
    """Stable BCE-with-logits on a (chunk_rows, 128) slab, folded to (8, 128).

    Matches torch's formulation: max(x,0) - x*t + log1p(exp(-|x|)).
    """
    xf = x.astype(jnp.float32)
    tf = t.astype(jnp.float32)
    bce = jnp.maximum(xf, 0.0) - xf * tf + jnp.log1p(jnp.exp(-jnp.abs(xf)))
    if mask:
        # Only instantiated for the (ragged) last grid block.
        row = row0 + lax.broadcasted_iota(jnp.int32, bce.shape, 0)
        bce = jnp.where(row < valid_rows, bce, 0.0)
    # (k*8, 128) -> (k, 8, 128) is layout-trivial; axis-0 sum is pure per-vreg
    # VPU adds (no cross-lane XLU reduce).
    return jnp.sum(bce.reshape(-1, SUBLANES, LANES), axis=0)


def _bce_partial_sum_kernel(x_ref, t_ref, o_ref, *, block_rows, chunk_rows,
                            valid_rows, ragged):
    """Writes one (8, 128) f32 partial BCE sum per grid step.

    x_ref/t_ref: (block_rows, 128) native-dtype tiles; o_ref: (8, 128) f32.
    """
    nchunks = block_rows // chunk_rows
    rem_rows = block_rows - nchunks * chunk_rows
    base = pl.program_id(0) * block_rows

    def block_sum(mask):
        def body(c, acc):
            r = pl.multiple_of(c * chunk_rows, chunk_rows)
            return acc + _bce_chunk(x_ref[pl.ds(r, chunk_rows), :],
                                    t_ref[pl.ds(r, chunk_rows), :],
                                    base + r, valid_rows, mask)

        acc = lax.fori_loop(0, nchunks, body,
                            jnp.zeros((SUBLANES, LANES), jnp.float32))
        if rem_rows:
            r = nchunks * chunk_rows  # static offset
            acc = acc + _bce_chunk(x_ref[pl.ds(r, rem_rows), :],
                                   t_ref[pl.ds(r, rem_rows), :],
                                   base + r, valid_rows, mask)
        return acc

    if ragged:
        is_last = pl.program_id(0) == pl.num_programs(0) - 1

        @pl.when(is_last)
        def _():
            o_ref[...] = block_sum(mask=True)

        @pl.when(jnp.logical_not(is_last))
        def _():
            o_ref[...] = block_sum(mask=False)
    else:
        o_ref[...] = block_sum(mask=False)


def _round_down_to(v, m):
    return max(m, (v // m) * m)


def _focal_loss_impl(inputs, targets, alpha=1.0, gamma=2, *,
                     block_rows=_DEFAULT_BLOCK_ROWS,
                     chunk_rows=_DEFAULT_CHUNK_ROWS):
    """Pallas TPU implementation of FocalLoss.forward (scalar f32)."""
    assert inputs.shape == targets.shape
    n = int(inputs.size)

    # Native dtypes straight through; casting happens inside the kernel so the
    # wrapper adds no extra HBM convert pass.
    x = inputs.reshape(-1)
    t = targets.reshape(-1)

    aligned = (n // _GROUP) * _GROUP
    total = jnp.float32(0.0)

    if aligned:
        rows = aligned // LANES                              # multiple of 8
        brows = _round_down_to(min(block_rows, rows), SUBLANES)
        crows = _round_down_to(min(chunk_rows, brows), SUBLANES)
        num_blocks = pl.cdiv(rows, brows)
        ragged = (rows % brows) != 0

        xb = x[:aligned].reshape(rows, LANES)                # lane-dense 2-D
        tb = t[:aligned].reshape(rows, LANES)

        kernel = functools.partial(
            _bce_partial_sum_kernel,
            block_rows=brows, chunk_rows=crows,
            valid_rows=rows, ragged=ragged)

        block_bytes = brows * LANES * (xb.dtype.itemsize + tb.dtype.itemsize)
        vmem_limit = int(min(64 << 20, max(32 << 20, 3 * block_bytes)))

        partials = pl.pallas_call(
            kernel,
            out_shape=jax.ShapeDtypeStruct((num_blocks * SUBLANES, LANES),
                                           jnp.float32),
            grid_spec=pltpu.PrefetchScalarGridSpec(
                num_scalar_prefetch=0,
                grid=(num_blocks,),
                in_specs=[
                    pl.BlockSpec((brows, LANES), lambda i: (i, 0)),
                    pl.BlockSpec((brows, LANES), lambda i: (i, 0)),
                ],
                out_specs=pl.BlockSpec((SUBLANES, LANES), lambda i: (i, 0)),
            ),
            compiler_params=pltpu.CompilerParams(
                # Independent per-block partial sums (no resident accumulator)
                # -> safe to shard the grid across both TensorCores on v7x.
                dimension_semantics=("parallel",),
                vmem_limit_bytes=vmem_limit,
            ),
        )(xb, tb)
        total = total + jnp.sum(partials, dtype=jnp.float32)

    if aligned < n:
        # <1024-element tail: fold into plain JAX instead of padding/copying.
        xt = x[aligned:].astype(jnp.float32)
        tt = t[aligned:].astype(jnp.float32)
        tail = jnp.maximum(xt, 0.0) - xt * tt + jnp.log1p(jnp.exp(-jnp.abs(xt)))
        total = total + jnp.sum(tail, dtype=jnp.float32)

    mean_bce = total / jnp.float32(n)
    bce_exp = jnp.exp(-mean_bce)
    return jnp.float32(alpha) * (1.0 - bce_exp) ** gamma * mean_bce


focal_loss = jax.jit(
    _focal_loss_impl,
    static_argnames=("alpha", "gamma", "block_rows", "chunk_rows"))


def _reference_focal_loss(inputs, targets, alpha=1.0, gamma=2):
    x = inputs.astype(jnp.float32)
    t = targets.astype(jnp.float32)
    bce = jnp.mean(jnp.maximum(x, 0.0) - x * t + jnp.log1p(jnp.exp(-jnp.abs(x))))
    bce_exp = jnp.exp(-bce)
    return alpha * (1.0 - bce_exp) ** gamma * bce


if __name__ == "__main__":
    key = jax.random.PRNGKey(0)

    # Small shapes; block/chunk overrides shrink tiles so the multi-block,
    # ragged-last-block and multi-chunk kernel paths are all exercised.
    cases = [
        ((2, 4, 16, 16), {}),                                   # aligned, single block
        ((3, 5, 7, 11), {}),                                    # unaligned -> wrapper tail
        ((4, 25), {}),                                          # all-tail (kernel skipped)
        ((2, 4, 32, 32), dict(block_rows=24, chunk_rows=16)),   # ragged grid + chunk remainder
        ((2, 8, 48, 64), dict(block_rows=128, chunk_rows=32)),  # multi-block, multi-chunk
    ]
    for shape, kw in cases:
        key, k1, k2 = jax.random.split(key, 3)
        inputs = jax.random.normal(k1, shape, dtype=jnp.float32)
        targets = (jax.random.uniform(k2, shape) > 0.5).astype(jnp.float32)

        out = focal_loss(inputs, targets, alpha=1.0, gamma=2, **kw)
        jax.block_until_ready(out)

        ref = _reference_focal_loss(inputs, targets, alpha=1.0, gamma=2)
        assert jnp.allclose(out, ref, rtol=1e-4, atol=1e-6), (shape, out, ref)

    print("KERNEL_OK")
</pallas_src>

<mosaic_0001>
module attributes {stable_mosaic.version = 11 : i64} {
  func.func @_bce_partial_sum_kernel(%arg0: i32, %arg1: memref<16x128xf32, #tpu.memory_space<vmem>>, %arg2: memref<16x128xf32, #tpu.memory_space<vmem>>, %arg3: memref<8x128xf32, #tpu.memory_space<vmem>>) attributes {dimension_semantics = [#tpu.dimension_semantics<parallel>], iteration_bounds = array<i64: 1>, scalar_prefetch = 0 : i64, scratch_operands = 0 : i64, tpu.core_type = #tpu.core_type<tc>, window_params = [{transform_indices = @transform_0, window_bounds = array<i64: 16, 128>}, {transform_indices = @transform_1, window_bounds = array<i64: 16, 128>}, {transform_indices = @transform_2, window_bounds = array<i64: 8, 128>}]} {
    %cst = arith.constant 0.000000e+00 : f32
    %0 = vector.broadcast %cst : f32 to vector<8x128xf32>
    %c0_i32 = arith.constant 0 : i32
    %c16_i32 = arith.constant 16 : i32
    %1 = arith.muli %c0_i32, %c16_i32 : i32
    %2 = tpu.assume_multiple %1, 16 : i32
    %3 = arith.index_cast %2 : i32 to index
    %c0 = arith.constant 0 : index
    %4 = vector.load %arg1[%3, %c0] : memref<16x128xf32, #tpu.memory_space<vmem>>, vector<16x128xf32>
    %5 = arith.index_cast %2 : i32 to index
    %c0_0 = arith.constant 0 : index
    %6 = vector.load %arg2[%5, %c0_0] : memref<16x128xf32, #tpu.memory_space<vmem>>, vector<16x128xf32>
    %cst_1 = arith.constant 0.000000e+00 : f32
    %7 = vector.broadcast %cst_1 : f32 to vector<16x128xf32>
    %8 = arith.maximumf %4, %7 : vector<16x128xf32>
    %9 = arith.mulf %4, %6 : vector<16x128xf32>
    %10 = arith.subf %8, %9 : vector<16x128xf32>
    %11 = math.absf %4 : vector<16x128xf32>
    %cst_2 = arith.constant 0.000000e+00 : f32
    %12 = vector.broadcast %cst_2 : f32 to vector<16x128xf32>
    %13 = arith.subf %12, %11 : vector<16x128xf32>
    %14 = math.exp %13 : vector<16x128xf32>
    %15 = math.log1p %14 : vector<16x128xf32>
    %16 = arith.addf %10, %15 : vector<16x128xf32>
    %17 = vector.shape_cast %16 : vector<16x128xf32> to vector<2x8x128xf32>
    %cst_3 = arith.constant dense<0.000000e+00> : vector<8x128xf32>
    %18 = vector.multi_reduction <add>, %17, %cst_3 [0] : vector<2x8x128xf32> to vector<8x128xf32>
    %19 = arith.addf %0, %18 : vector<8x128xf32>
    %c1_i32 = arith.constant 1 : i32
    %c0_4 = arith.constant 0 : index
    %c0_5 = arith.constant 0 : index
    %20 = vector.load %arg3[%c0_4, %c0_5] : memref<8x128xf32, #tpu.memory_space<vmem>>, vector<8x128xf32>
    tpu.vector_store %arg3[%c0_4, %c0_5], %19 {strides = array<i32>} : memref<8x128xf32, #tpu.memory_space<vmem>>, vector<8x128xf32>,
    return
  }
  func.func @transform_0(%arg0: i32) -> (i32, i32) {
    %c0_i32 = arith.constant 0 : i32
    %c0_i32_0 = arith.constant 0 : i32
    return %arg0, %c0_i32 : i32, i32
  }
  func.func @transform_1(%arg0: i32) -> (i32, i32) {
    %c0_i32 = arith.constant 0 : i32
    %c0_i32_0 = arith.constant 0 : i32
    return %arg0, %c0_i32 : i32, i32
  }
  func.func @transform_2(%arg0: i32) -> (i32, i32) {
    %c0_i32 = arith.constant 0 : i32
    %c0_i32_0 = arith.constant 0 : i32
    return %arg0, %c0_i32 : i32, i32
  }
}

</mosaic_0001>

<bundles_post_ra>
// kernel: _focal_loss_impl.1
= control target key start
LH: loop header
LB: loop body
LE: loop exit
PB: predicated region body
PF: predicated region fallthrough
CT: control target
= control target key end

     0   :  { %s94_s0 = inlined_call_operand.vmem [shape: f32[16,128], index: 0, kind: input, shape index: {}]   ;;  %s95_s1 = inlined_call_operand.vmem [shape: f32[16,128], index: 1, kind: input, shape index: {}]   ;;  %s96_s2 = inlined_call_operand.vmem [shape: f32[8,128], index: 2, kind: output, shape index: {}]  }
   0x1   :  { %v11_v0 = vld [vmem:[%s94_s0] sm:$0xff]  ;;  %v12_v1 = vld [vmem:[%s94_s0 + $0x8] sm:$0xff] }
   0x2   :  { %v21_v2 = vand.u32 2147483647, %v11_v0  ;;  %v22_v3 = vand.u32 2147483647, %v12_v1  ;;  %v13_v14 = vld [vmem:[%s95_s1] sm:$0xff]  ;;  %v14_v15 = vld [vmem:[%s95_s1 + $0x8] sm:$0xff] }
   0x3   :  { %v15_v17 = vmax.f32 %v11_v0, 0.0  ;;  %v17_v18 = vmul.f32 %v13_v14, %v11_v0  ;;  %v16_v21 = vmax.f32 %v12_v1, 0.0  ;;  %v18_v22 = vmul.f32 %v14_v15, %v12_v1 }
   0x4   :  { %v23_v4 = vsub.f32 0.0, %v21_v2  ;;  %v24_v5 = vsub.f32 0.0, %v22_v3 }
   0x5   :  { %v19_v26 = vsub.f32 %v15_v17, %v17_v18  ;;  %v20_v29 = vsub.f32 %v16_v21, %v18_v22 }
   0x6   :  { %v25_v6 = vmul.f32 1.442695, %v23_v4  ;;  %v27_v7 = vmul.f32 1.442695, %v24_v5 }
   0x8   :  { %56 = vpow2.f32 %v25_v6 }
   0x9   :  { %58 = vpow2.f32 %v27_v7 }
  0x15   :  { %v57_v8 = vpop.eup %56 }
  0x16   :  { %v59_v9 = vpop.eup %58  ;;  %v29_v10 = vadd.f32 1.0, %v57_v8  ;;  %v32_v12 = vmul.f32 -0.5, %v57_v8  ;;  %v35_v19 = vand.u32 2147483647, %v57_v8 }
  0x17   :  { %v38_v11 = vadd.f32 1.0, %v59_v9  ;;  %v41_v13 = vmul.f32 -0.5, %v59_v9  ;;  %v44_v23 = vand.u32 2147483647, %v59_v9 }
  0x18   :  { %60 = vlog2.f32 %v29_v10  ;;  %v33_v16 = vadd.f32 1.0, %v32_v12  ;;  %vm36_vm0 = vcmp.lt.f32.partialorder %v35_v19, 0.0004427343 }
  0x19   :  { %62 = vlog2.f32 %v38_v11  ;;  %v42_v20 = vadd.f32 1.0, %v41_v13  ;;  %vm45_vm1 = vcmp.lt.f32.partialorder %v44_v23, 0.0004427343 }
  0x1a   :  { %v34_v24 = vmul.f32 %v57_v8, %v33_v16 }
  0x1b   :  { %v43_v27 = vmul.f32 %v59_v9, %v42_v20 }
  0x25   :  { %v61_v25 = vpop.eup %60 }
  0x26   :  { %v63_v28 = vpop.eup %62  ;;  %v31_v30 = vmul.f32 0.6931472, %v61_v25 }
  0x27   :  { %v40_v31 = vmul.f32 0.6931472, %v63_v28 }
  0x28   :  { %v37_v32 = vsel %vm36_vm0, %v34_v24, %v31_v30 }
  0x29   :  { %v46_v33 = vsel %vm45_vm1, %v43_v27, %v40_v31  ;;  %v47_v34 = vadd.f32 %v37_v32, %v19_v26 }
  0x2a   :  { %v48_v35 = vadd.f32 %v46_v33, %v20_v29 }
  0x2c   :  { %v49_v36 = vadd.f32 %v48_v35, %v47_v34 }
  0x2e   :  { %51 = vst [vmem:[%s96_s2] sm:$0xff] %v49_v36 }

</bundles_post_ra>
